<compile_context>
chip_gen: v7x
topology: tpu7x:2x2x1
jax: 0.10.0
libtpu: 0.0.40
codegen_flags: <defaults>
</compile_context>

<pallas_src>
import jax
import jax.numpy as jnp
from jax.experimental import pallas as pl
from jax.experimental.pallas import tpu as pltpu

_HIDDEN = 64
_HIDDEN_PAD = 128  # pad hidden dim to a full 128-lane width


def _round_up(n, m):
    return ((n + m - 1) // m) * m


def _vmem_limit_bytes():
    """48 MiB on v7x (64 MiB physical VMEM per TC), 64 MiB on v5e/v6e (128 MiB)."""
    try:
        kind = jax.devices()[0].device_kind.lower()
    except Exception:
        kind = ""
    if ("v7" in kind) or ("tpu7" in kind):
        return 48 * 1024 * 1024
    return 64 * 1024 * 1024


def _regressor_kernel(x_ref, w1_ref, b1_ref, w2_ref, b2_ref, w3_ref, b3_ref, o_ref):
    # x tile: (TM, D) f32.  Weights bf16 stored (in, out); biases f32 (1, out).
    xb = x_ref[...].astype(jnp.bfloat16)

    h1 = jnp.dot(xb, w1_ref[...], preferred_element_type=jnp.float32) + b1_ref[...]
    h1 = jnp.maximum(h1, 0.0)

    h2 = jnp.dot(h1.astype(jnp.bfloat16), w2_ref[...],
                 preferred_element_type=jnp.float32) + b2_ref[...]
    h2 = jnp.maximum(h2, 0.0)

    y = jnp.dot(h2.astype(jnp.bfloat16), w3_ref[...],
                preferred_element_type=jnp.float32)
    # Re-read x_ref here (instead of carrying it from the top) to keep the f32
    # residual tile's live range short at large TM.
    o_ref[...] = (y + b3_ref[...] + x_ref[...]).astype(o_ref.dtype)


def _prepare_params(params):
    """Pad hidden dim 64->128 with zeros; cast matmul operands to bf16 (biases stay f32)."""
    w1, b1 = params["w1"], params["b1"]
    w2, b2 = params["w2"], params["b2"]
    w3, b3 = params["w3"], params["b3"]
    h = w1.shape[1]
    hp = _round_up(max(h, _HIDDEN_PAD), 128)
    pad = hp - h
    if pad:
        w1 = jnp.pad(w1, ((0, 0), (0, pad)))
        b1 = jnp.pad(b1, ((0, 0), (0, pad)))
        w2 = jnp.pad(w2, ((0, pad), (0, pad)))
        b2 = jnp.pad(b2, ((0, 0), (0, pad)))
        w3 = jnp.pad(w3, ((0, pad), (0, 0)))
    return (w1.astype(jnp.bfloat16), b1.astype(jnp.float32),
            w2.astype(jnp.bfloat16), b2.astype(jnp.float32),
            w3.astype(jnp.bfloat16), b3.astype(jnp.float32))


def _pick_batch_tile(B, tile_m):
    """Tile that (a) caps at tile_m and (b) keeps padded rows to at most 7 per grid step."""
    tile_m = max(8, _round_up(tile_m, 8))
    n_tiles = -(-B // tile_m)                 # ceil(B / tile_m)
    tm = _round_up(-(-B // n_tiles), 8)       # even split, rounded to sublane multiple
    return min(tm, tile_m)


def regressor_f_forward(x, params, *, tile_m=8192):
    """x: (B, D) float32. params: dict of w1,b1,w2,b2,w3,b3 with weights stored (in, out)."""
    assert x.ndim == 2
    B, D = x.shape
    w1, b1, w2, b2, w3, b3 = _prepare_params(params)
    assert w1.shape[0] == D, "w1 must be (input_dim, hidden)"
    assert w3.shape[1] == D, "residual `+ x` requires input_dim == output_dim"
    hp = w1.shape[1]

    tm = _pick_batch_tile(B, tile_m)
    b_pad = _round_up(B, tm)
    x_in = jnp.pad(x, ((0, b_pad - B), (0, 0))) if b_pad != B else x
    grid = (b_pad // tm,)

    batch_map = lambda i: (i, 0)
    resident = lambda i: (0, 0)  # weights/biases stay pinned in VMEM across the grid

    weight_bytes = (w1.size + w2.size + w3.size) * 2 + (b1.size + b2.size + b3.size) * 4
    cost = pl.CostEstimate(
        flops=2 * b_pad * (D * hp + hp * hp + hp * D),
        transcendentals=0,
        bytes_accessed=2 * b_pad * D * 4 + weight_bytes,
    )

    out = pl.pallas_call(
        _regressor_kernel,
        out_shape=jax.ShapeDtypeStruct((b_pad, D), x.dtype),
        grid=grid,
        in_specs=[
            pl.BlockSpec((tm, D), batch_map),   # x tile (double-buffered by Pallas)
            pl.BlockSpec((D, hp), resident),    # w1
            pl.BlockSpec((1, hp), resident),    # b1
            pl.BlockSpec((hp, hp), resident),   # w2
            pl.BlockSpec((1, hp), resident),    # b2
            pl.BlockSpec((hp, D), resident),    # w3
            pl.BlockSpec((1, D), resident),     # b3
        ],
        out_specs=pl.BlockSpec((tm, D), batch_map),
        compiler_params=pltpu.CompilerParams(
            dimension_semantics=("parallel",),
            vmem_limit_bytes=_vmem_limit_bytes(),
        ),
        cost_estimate=cost,
    )(x_in, w1, b1, w2, b2, w3, b3)
    return out[:B] if b_pad != B else out


def init_params(key, input_dim, output_dim, hidden=_HIDDEN):
    """Deterministic PyTorch-style Linear init: U(-1/sqrt(fan_in), 1/sqrt(fan_in))."""
    def linear(k, fan_in, fan_out):
        kw, kb = jax.random.split(k)
        bound = 1.0 / jnp.sqrt(fan_in)
        # stored as (in, out) so the kernel computes x @ W + b
        w = jax.random.uniform(kw, (fan_in, fan_out), jnp.float32, -bound, bound)
        b = jax.random.uniform(kb, (1, fan_out), jnp.float32, -bound, bound)
        return w, b

    k1, k2, k3 = jax.random.split(key, 3)
    w1, b1 = linear(k1, input_dim, hidden)
    w2, b2 = linear(k2, hidden, hidden)
    w3, b3 = linear(k3, hidden, output_dim)
    return {"w1": w1, "b1": b1, "w2": w2, "b2": b2, "w3": w3, "b3": b3}


def _reference_forward(x, p):
    h1 = jnp.maximum(x @ p["w1"] + p["b1"], 0.0)
    h2 = jnp.maximum(h1 @ p["w2"] + p["b2"], 0.0)
    return h2 @ p["w3"] + p["b3"] + x


if __name__ == "__main__":
    D = 32  # input_dim == output_dim (residual connection)
    key = jax.random.PRNGKey(0)
    kx, kp = jax.random.split(key)
    params = init_params(kp, input_dim=D, output_dim=D)

    # 1) tiny batch (single grid step, default large tile collapses to tm=8)
    x_small = jax.random.normal(kx, (8, D), jnp.float32)
    out_small = jax.block_until_ready(regressor_f_forward(x_small, params))
    ref_small = _reference_forward(x_small, params)
    assert out_small.shape == x_small.shape
    assert jnp.allclose(out_small, ref_small, atol=5e-2, rtol=5e-2), (
        float(jnp.max(jnp.abs(out_small - ref_small))))

    # 2) batch exercising the tiled grid + minimal ragged padding
    #    (B=100, tile_m=64 -> tm=56, grid=2, only 12 padded rows instead of 28)
    x_big = jax.random.normal(jax.random.fold_in(kx, 1), (100, D), jnp.float32)
    out_big = jax.block_until_ready(regressor_f_forward(x_big, params, tile_m=64))
    ref_big = _reference_forward(x_big, params)
    assert out_big.shape == x_big.shape
    assert jnp.allclose(out_big, ref_big, atol=5e-2, rtol=5e-2), (
        float(jnp.max(jnp.abs(out_big - ref_big))))

    print("KERNEL_OK")
</pallas_src>

<mosaic_0001>
module attributes {stable_mosaic.version = 11 : i64} {
  func.func @_regressor_kernel(%arg0: i32, %arg1: memref<8x32xf32, #tpu.memory_space<vmem>>, %arg2: memref<32x128xbf16, #tpu.memory_space<vmem>>, %arg3: memref<1x128xf32, #tpu.memory_space<vmem>>, %arg4: memref<128x128xbf16, #tpu.memory_space<vmem>>, %arg5: memref<1x128xf32, #tpu.memory_space<vmem>>, %arg6: memref<128x32xbf16, #tpu.memory_space<vmem>>, %arg7: memref<1x32xf32, #tpu.memory_space<vmem>>, %arg8: memref<8x32xf32, #tpu.memory_space<vmem>>) attributes {dimension_semantics = [#tpu.dimension_semantics<parallel>], iteration_bounds = array<i64: 1>, scalar_prefetch = 0 : i64, scratch_operands = 0 : i64, tpu.core_type = #tpu.core_type<tc>, window_params = [{transform_indices = @transform_0, window_bounds = array<i64: 8, 32>}, {pipeline_mode = #tpu.pipeline_mode<synchronous>, transform_indices = @transform_1, window_bounds = array<i64: 32, 128>}, {pipeline_mode = #tpu.pipeline_mode<synchronous>, transform_indices = @transform_2, window_bounds = array<i64: 1, 128>}, {pipeline_mode = #tpu.pipeline_mode<synchronous>, transform_indices = @transform_3, window_bounds = array<i64: 128, 128>}, {pipeline_mode = #tpu.pipeline_mode<synchronous>, transform_indices = @transform_4, window_bounds = array<i64: 1, 128>}, {pipeline_mode = #tpu.pipeline_mode<synchronous>, transform_indices = @transform_5, window_bounds = array<i64: 128, 32>}, {pipeline_mode = #tpu.pipeline_mode<synchronous>, transform_indices = @transform_6, window_bounds = array<i64: 1, 32>}, {transform_indices = @transform_7, window_bounds = array<i64: 8, 32>}]} {
    %c0 = arith.constant 0 : index
    %c0_0 = arith.constant 0 : index
    %0 = vector.load %arg1[%c0, %c0_0] : memref<8x32xf32, #tpu.memory_space<vmem>>, vector<8x32xf32>
    %1 = arith.truncf %0 : vector<8x32xf32> to vector<8x32xbf16>
    %c0_1 = arith.constant 0 : index
    %c0_2 = arith.constant 0 : index
    %2 = vector.load %arg2[%c0_1, %c0_2] : memref<32x128xbf16, #tpu.memory_space<vmem>>, vector<32x128xbf16>
    %cst = arith.constant dense<0.000000e+00> : vector<8x128xf32>
    %3 = tpu.matmul %1, %2, %cst {dimension_numbers = #tpu.dot_dimension_numbers<[1], [0], [0], [1], [0, 0, 1, 1], [], []>} : vector<8x32xbf16>, vector<32x128xbf16>, vector<8x128xf32> -> vector<8x128xf32>
    %c0_3 = arith.constant 0 : index
    %c0_4 = arith.constant 0 : index
    %4 = vector.load %arg3[%c0_3, %c0_4] : memref<1x128xf32, #tpu.memory_space<vmem>>, vector<1x128xf32>
    %5 = vector.broadcast %4 : vector<1x128xf32> to vector<8x128xf32>
    %6 = arith.addf %3, %5 : vector<8x128xf32>
    %cst_5 = arith.constant 0.000000e+00 : f32
    %7 = vector.broadcast %cst_5 : f32 to vector<8x128xf32>
    %8 = arith.maximumf %6, %7 : vector<8x128xf32>
    %9 = arith.truncf %8 : vector<8x128xf32> to vector<8x128xbf16>
    %c0_6 = arith.constant 0 : index
    %c0_7 = arith.constant 0 : index
    %10 = vector.load %arg4[%c0_6, %c0_7] : memref<128x128xbf16, #tpu.memory_space<vmem>>, vector<128x128xbf16>
    %cst_8 = arith.constant dense<0.000000e+00> : vector<8x128xf32>
    %11 = tpu.matmul %9, %10, %cst_8 {dimension_numbers = #tpu.dot_dimension_numbers<[1], [0], [0], [1], [0, 0, 1, 1], [], []>} : vector<8x128xbf16>, vector<128x128xbf16>, vector<8x128xf32> -> vector<8x128xf32>
    %c0_9 = arith.constant 0 : index
    %c0_10 = arith.constant 0 : index
    %12 = vector.load %arg5[%c0_9, %c0_10] : memref<1x128xf32, #tpu.memory_space<vmem>>, vector<1x128xf32>
    %13 = vector.broadcast %12 : vector<1x128xf32> to vector<8x128xf32>
    %14 = arith.addf %11, %13 : vector<8x128xf32>
    %cst_11 = arith.constant 0.000000e+00 : f32
    %15 = vector.broadcast %cst_11 : f32 to vector<8x128xf32>
    %16 = arith.maximumf %14, %15 : vector<8x128xf32>
    %17 = arith.truncf %16 : vector<8x128xf32> to vector<8x128xbf16>
    %c0_12 = arith.constant 0 : index
    %c0_13 = arith.constant 0 : index
    %18 = vector.load %arg6[%c0_12, %c0_13] : memref<128x32xbf16, #tpu.memory_space<vmem>>, vector<128x32xbf16>
    %cst_14 = arith.constant dense<0.000000e+00> : vector<8x32xf32>
    %19 = tpu.matmul %17, %18, %cst_14 {dimension_numbers = #tpu.dot_dimension_numbers<[1], [0], [0], [1], [0, 0, 1, 1], [], []>} : vector<8x128xbf16>, vector<128x32xbf16>, vector<8x32xf32> -> vector<8x32xf32>
    %c0_15 = arith.constant 0 : index
    %c0_16 = arith.constant 0 : index
    %20 = vector.load %arg7[%c0_15, %c0_16] : memref<1x32xf32, #tpu.memory_space<vmem>>, vector<1x32xf32>
    %21 = vector.broadcast %20 : vector<1x32xf32> to vector<8x32xf32>
    %22 = arith.addf %19, %21 : vector<8x32xf32>
    %c0_17 = arith.constant 0 : index
    %c0_18 = arith.constant 0 : index
    %23 = vector.load %arg1[%c0_17, %c0_18] : memref<8x32xf32, #tpu.memory_space<vmem>>, vector<8x32xf32>
    %24 = arith.addf %22, %23 : vector<8x32xf32>
    %c0_19 = arith.constant 0 : index
    %c0_20 = arith.constant 0 : index
    %25 = vector.load %arg8[%c0_19, %c0_20] : memref<8x32xf32, #tpu.memory_space<vmem>>, vector<8x32xf32>
    tpu.vector_store %arg8[%c0_19, %c0_20], %24 {strides = array<i32>} : memref<8x32xf32, #tpu.memory_space<vmem>>, vector<8x32xf32>,
    return
  }
  func.func @transform_0(%arg0: i32) -> (i32, i32) {
    %c0_i32 = arith.constant 0 : i32
    %c0_i32_0 = arith.constant 0 : i32
    return %arg0, %c0_i32 : i32, i32
  }
  func.func @transform_1(%arg0: i32) -> (i32, i32) {
    %c0_i32 = arith.constant 0 : i32
    %c0_i32_0 = arith.constant 0 : i32
    %c0_i32_1 = arith.constant 0 : i32
    return %c0_i32, %c0_i32_0 : i32, i32
  }
  func.func @transform_2(%arg0: i32) -> (i32, i32) {
    %c0_i32 = arith.constant 0 : i32
    %c0_i32_0 = arith.constant 0 : i32
    %c0_i32_1 = arith.constant 0 : i32
    return %c0_i32, %c0_i32_0 : i32, i32
  }
  func.func @transform_3(%arg0: i32) -> (i32, i32) {
    %c0_i32 = arith.constant 0 : i32
    %c0_i32_0 = arith.constant 0 : i32
    %c0_i32_1 = arith.constant 0 : i32
    return %c0_i32, %c0_i32_0 : i32, i32
  }
  func.func @transform_4(%arg0: i32) -> (i32, i32) {
    %c0_i32 = arith.constant 0 : i32
    %c0_i32_0 = arith.constant 0 : i32
    %c0_i32_1 = arith.constant 0 : i32
    return %c0_i32, %c0_i32_0 : i32, i32
  }
  func.func @transform_5(%arg0: i32) -> (i32, i32) {
    %c0_i32 = arith.constant 0 : i32
    %c0_i32_0 = arith.constant 0 : i32
    %c0_i32_1 = arith.constant 0 : i32
    return %c0_i32, %c0_i32_0 : i32, i32
  }
  func.func @transform_6(%arg0: i32) -> (i32, i32) {
    %c0_i32 = arith.constant 0 : i32
    %c0_i32_0 = arith.constant 0 : i32
    %c0_i32_1 = arith.constant 0 : i32
    return %c0_i32, %c0_i32_0 : i32, i32
  }
  func.func @transform_7(%arg0: i32) -> (i32, i32) {
    %c0_i32 = arith.constant 0 : i32
    %c0_i32_0 = arith.constant 0 : i32
    return %arg0, %c0_i32 : i32, i32
  }
}

</mosaic_0001>

<bundles_post_ra>
// kernel: tpu_custom_call.1
= control target key start
LH: loop header
LB: loop body
LE: loop exit
PB: predicated region body
PF: predicated region fallthrough
CT: control target
= control target key end

     0   :  { %12 = vsyncpa [#allocation3], 0  ;;  %s925_s0 = inlined_call_operand.hbm [shape: f32[8,32], index: 0, kind: input, shape index: {}]   ;;  %s926_s1 = inlined_call_operand.hbm [shape: bf16[32,128], index: 1, kind: input, shape index: {}]   ;;  %s927_s2 = inlined_call_operand.hbm [shape: f32[1,128], index: 2, kind: input, shape index: {}]   ;;  %s928_s3 = inlined_call_operand.hbm [shape: bf16[128,128], index: 3, kind: input, shape index: {}]   ;;  %s929_s4 = inlined_call_operand.hbm [shape: f32[1,128], index: 4, kind: input, shape index: {}]   ;;  %s930_s5 = inlined_call_operand.hbm [shape: bf16[128,32], index: 5, kind: input, shape index: {}]   ;;  %s931_s6 = inlined_call_operand.hbm [shape: f32[1,32], index: 6, kind: input, shape index: {}]   ;;  %s932_s7 = inlined_call_operand.hbm [shape: f32[8,32], index: 7, kind: output, shape index: {}]  }
   0x1   :  { %13 = vsyncpa [#allocation6], 0 }
   0x2   :  { %14 = vsyncpa [#allocation9], 0 }
   0x3   :  { %15 = vsyncpa [#allocation12], 0 }
   0x4   :  { %16 = vsyncpa [#allocation4], 0  ;;  %s737_s24 = smov [#allocation5]   ;;  %s551_s28 = scalar_lea.hbm %s926_s1, 256 }
   0x5   :  { %s32_s25 = sshll.u32 %s737_s24, 4  ;;  %p552_p0 = scmp.ne.s32.totalorder %s926_s1, %s551_s28  ;;  %s33_s25 = int_to_ptr.vmem [resolvable:$true] %s32_s25 }
   0x6   :  { %p555_p1 = scmp.lt.u32.totalorder %s551_s28, %s926_s1 }
   0x8   :  { %p557_p2 = pnand %p555_p1, %p552_p0 }
   0xa   :  { %560 = shalt.err (!%p557_p2)
}
   0xb   :  { %s561_s10 = scalar_lea.vmem %s33_s25, 256  ;;  %p566_p4 = scmp.lt.s32.totalorder %s33_s25, %s33_s25 }
   0xc   :  { %p562_p3 = scmp.ne.s32.totalorder %s33_s25, %s561_s10  ;;  %p567_p5 = scmp.lt.s32.totalorder %s561_s10, %s561_s10 }
   0xe   :  { %p568_p6 = por %p567_p5, %p566_p4 }
  0x10   :  { %p569_p7 = pnand %p568_p6, %p562_p3 }
  0x12   :  { %572 = shalt.err (!%p569_p7)
}
  0x13   :  { %s738_s11 = smov 64   ;;  %s739_s12 = smov 4  }
  0x14   :  { %38 = dma.hbm_to_vmem [thread:$0]  %s926_s1, 256, %s33_s25, [#allocation6], %s738_s11, %s738_s11, %s739_s12  }
  0x15   :  { %s740_s15 = smov [#allocation8]   ;;  %s741_s17 = smov [#allocation11]  }
  0x16   :  { %s54_s16 = sshll.u32 %s740_s15, 4  ;;  %s76_s18 = sshll.u32 %s741_s17, 4  ;;  %s55_s16 = int_to_ptr.vmem [resolvable:$true] %s54_s16  ;;  %s77_s18 = int_to_ptr.vmem [resolvable:$true] %s76_s18 }
  0x17   :  { %s573_s21 = scalar_lea.hbm %s928_s3, 1024 }
  0x18   :  { %p574_p8 = scmp.ne.s32.totalorder %s928_s3, %s573_s21  ;;  %p577_p9 = scmp.lt.u32.totalorder %s573_s21, %s928_s3 }
  0x1a   :  { %p579_p10 = pnand %p577_p9, %p574_p8 }
  0x1c   :  { %582 = shalt.err (!%p579_p10)
}
  0x1d   :  { %s583_s1 = scalar_lea.vmem %s55_s16, 1024  ;;  %p588_p12 = scmp.lt.s32.totalorder %s55_s16, %s55_s16 }
  0x1e   :  { %p584_p11 = scmp.ne.s32.totalorder %s55_s16, %s583_s1  ;;  %p589_p13 = scmp.lt.s32.totalorder %s583_s1, %s583_s1 }
  0x20   :  { %p590_p0 = por %p589_p13, %p588_p12 }
  0x22   :  { %p591_p1 = pnand %p590_p0, %p584_p11 }
  0x24   :  { %594 = shalt.err (!%p591_p1)
}
  0x25   :  { %60 = dma.hbm_to_vmem [thread:$0]  %s928_s3, 1024, %s55_s16, [#allocation9], %s738_s11, %s738_s11, %s739_s12  }
  0x26   :  { %s595_s30 = scalar_lea.hbm %s930_s5, 1024 }
  0x27   :  { %p596_p2 = scmp.ne.s32.totalorder %s930_s5, %s595_s30  ;;  %p599_p3 = scmp.lt.u32.totalorder %s595_s30, %s930_s5 }
  0x29   :  { %p601_p4 = pnand %p599_p3, %p596_p2 }
  0x2b   :  { %604 = shalt.err (!%p601_p4)
}
  0x2c   :  { %s605_s14 = scalar_lea.vmem %s77_s18, 1024  ;;  %p610_p6 = scmp.lt.s32.totalorder %s77_s18, %s77_s18 }
  0x2d   :  { %p606_p5 = scmp.ne.s32.totalorder %s77_s18, %s605_s14  ;;  %p611_p7 = scmp.lt.s32.totalorder %s605_s14, %s605_s14 }
  0x2f   :  { %p612_p8 = por %p611_p7, %p610_p6 }
  0x31   :  { %p613_p9 = pnand %p612_p8, %p606_p5 }
  0x33   :  { %616 = shalt.err (!%p613_p9)
}
  0x34   :  { %82 = dma.hbm_to_vmem [thread:$0]  %s930_s5, 1024, %s77_s18, [#allocation12], %s738_s11, %s738_s11, %s739_s12  }
  0x35   :  { %s742_s16 = smov [#allocation2]   ;;  %s743_s19 = smov [#allocation7]  }
  0x36   :  { %s23_s17 = sshll.u32 %s742_s16, 4  ;;  %s45_s20 = sshll.u32 %s743_s19, 4  ;;  %s24_s17 = int_to_ptr.vmem [resolvable:$true] %s23_s17  ;;  %s46_s20 = int_to_ptr.vmem [resolvable:$true] %s45_s20 }
  0x37   :  { %s617_s23 = scalar_lea.hbm %s925_s0, 128 }
  0x38   :  { %p618_p10 = scmp.ne.s32.totalorder %s925_s0, %s617_s23  ;;  %p621_p11 = scmp.lt.u32.totalorder %s617_s23, %s925_s0 }
  0x3a   :  { %p623_p12 = pnand %p621_p11, %p618_p10 }
  0x3c   :  { %626 = shalt.err (!%p623_p12)
}
  0x3d   :  { %s627_s5 = scalar_lea.vmem %s24_s17, 128  ;;  %p632_p0 = scmp.lt.s32.totalorder %s24_s17, %s24_s17 }
  0x3e   :  { %p628_p13 = scmp.ne.s32.totalorder %s24_s17, %s627_s5  ;;  %p633_p1 = scmp.lt.s32.totalorder %s627_s5, %s627_s5 }
  0x40   :  { %p634_p2 = por %p633_p1, %p632_p0 }
  0x42   :  { %p635_p3 = pnand %p634_p2, %p628_p13 }
  0x44   :  { %638 = shalt.err (!%p635_p3)
}
  0x45   :  { %26 = dma.hbm_to_vmem [thread:$0]  %s925_s0, 128, %s24_s17, [#allocation3]  }
  0x46   :  { %s639_s28 = scalar_lea.hbm %s927_s2, 16 }
  0x47   :  { %p640_p4 = scmp.ne.s32.totalorder %s927_s2, %s639_s28  ;;  %p643_p5 = scmp.lt.u32.totalorder %s639_s28, %s927_s2 }
  0x49   :  { %p645_p6 = pnand %p643_p5, %p640_p4 }
  0x4b   :  { %648 = shalt.err (!%p645_p6)
}
  0x4c   :  { %s649_s10 = scalar_lea.vmem %s46_s20, 16  ;;  %s653_s13 = scalar_lea.vmem %s46_s20, 32 }
  0x4d   :  { %p650_p7 = scmp.ne.s32.totalorder %s46_s20, %s649_s10  ;;  %p654_p8 = scmp.lt.s32.totalorder %s46_s20, %s46_s20 }
  0x4e   :  { %p655_p9 = scmp.lt.s32.totalorder %s653_s13, %s649_s10 }
  0x50   :  { %p656_p10 = por %p655_p9, %p654_p8 }
  0x52   :  { %p657_p11 = pnand %p656_p10, %p650_p7 }
  0x54   :  { %660 = shalt.err (!%p657_p11)
}
  0x55   :  { %48 = dma.hbm_to_vmem [thread:$0]  %s927_s2, 16, %s46_s20, [#allocation6]  }
  0x56   :  { %s744_s3 = smov [#allocation10]   ;;  %s745_s16 = smov [#allocation13]  }
  0x57   :  { %s67_s15 = sshll.u32 %s744_s3, 4  ;;  %s89_s17 = sshll.u32 %s745_s16, 4  ;;  %s68_s15 = int_to_ptr.vmem [resolvable:$true] %s67_s15  ;;  %s90_s17 = int_to_ptr.vmem [resolvable:$true] %s89_s17 }
  0x58   :  { %s661_s22 = scalar_lea.hbm %s929_s4, 16 }
  0x59   :  { %p662_p12 = scmp.ne.s32.totalorder %s929_s4, %s661_s22  ;;  %p665_p13 = scmp.lt.u32.totalorder %s661_s22, %s929_s4 }
  0x5b   :  { %p667_p0 = pnand %p665_p13, %p662_p12 }
  0x5d   :  { %670 = shalt.err (!%p667_p0)
}
  0x5e   :  { %s671_s2 = scalar_lea.vmem %s68_s15, 16  ;;  %s675_s20 = scalar_lea.vmem %s68_s15, 32 }
  0x5f   :  { %p672_p1 = scmp.ne.s32.totalorder %s68_s15, %s671_s2  ;;  %p676_p2 = scmp.lt.s32.totalorder %s68_s15, %s68_s15 }
  0x60   :  { %p677_p3 = scmp.lt.s32.totalorder %s675_s20, %s671_s2 }
  0x62   :  { %p678_p4 = por %p677_p3, %p676_p2 }
  0x64   :  { %p679_p5 = pnand %p678_p4, %p672_p1 }
  0x66   :  { %682 = shalt.err (!%p679_p5)
}
  0x67   :  { %70 = dma.hbm_to_vmem [thread:$0]  %s929_s4, 16, %s68_s15, [#allocation9]  }
  0x68   :  { %s683_s18 = scalar_lea.hbm %s931_s6, 16 }
  0x69   :  { %p684_p6 = scmp.ne.s32.totalorder %s931_s6, %s683_s18  ;;  %p687_p7 = scmp.lt.u32.totalorder %s683_s18, %s931_s6 }
  0x6b   :  { %p689_p8 = pnand %p687_p7, %p684_p6 }
  0x6d   :  { %692 = shalt.err (!%p689_p8)
}
  0x6e   :  { %s693_s8 = scalar_lea.vmem %s90_s17, 16  ;;  %s697_s9 = scalar_lea.vmem %s90_s17, 32 }
  0x6f   :  { %p694_p9 = scmp.ne.s32.totalorder %s90_s17, %s693_s8  ;;  %p698_p10 = scmp.lt.s32.totalorder %s90_s17, %s90_s17 }
  0x70   :  { %p699_p11 = scmp.lt.s32.totalorder %s697_s9, %s693_s8 }
  0x72   :  { %p700_p12 = por %p699_p11, %p698_p10 }
  0x74   :  { %p701_p13 = pnand %p700_p12, %p694_p9 }
  0x76   :  { %704 = shalt.err (!%p701_p13)
}
  0x77   :  { %92 = dma.hbm_to_vmem [thread:$0]  %s931_s6, 16, %s90_s17, [#allocation12]  }
  0x78   :  { %727 = dma.done.wait [#allocation3], 128  }
  0x79   :  { %728 = vsyncadd [#allocation3], 4294967168 }
  0x7a   :  { %729 = dma.done.wait [#allocation6], 272  }
  0x7b   :  { %730 = vsyncadd [#allocation6], 4294967024 }
  0x7c   :  { %731 = dma.done.wait [#allocation9], 1040  }
  0x7d   :  { %732 = vsyncadd [#allocation9], 4294966256 }
  0x7e   :  { %733 = dma.done.wait [#allocation12], 1040  }
  0x7f   :  { %734 = vsyncadd [#allocation12], 4294966256  ;;  %v746_v0 = vmov 0.0   ;;  %vm747_vm0 = vmmov 0   ;;  %v533_v1 = vld [vmem:[#allocation5] sm:$0xff]   ;;  %v534_v2 = vld [vmem:[#allocation5 + $0x8] sm:$0xff]  }
  0x80   :  { %473 = vmatprep.subr.bf16.mxu0 %v746_v0  ;;  %477 = vmatprep.mubr.msk.bf16.mxu0 %vm747_vm0, %v746_v0  ;;  %v888_v3 = vld [vmem:[#allocation2] sm:$0xff]  ;;  %vm140_vm1 = vcmask 261120   ;;  %v537_v7 = vld [vmem:[#allocation8 + $0x10] sm:$0xff]   ;;  %v538_v8 = vld [vmem:[#allocation8 + $0x18] sm:$0xff]   ;;  %s748_s6 = smov [#allocation14]  }
  0x81   :  { %481 = vmatprep.subr.bf16.mxu1 %v746_v0  ;;  %497 = vmatprep.mubr.msk.bf16.mxu1 %vm747_vm0, %v746_v0  ;;  %v535_v4 = vld [vmem:[#allocation8] sm:$0xff]   ;;  %v116_v5 = vpack.c.bf16 %v888_v3, %v888_v3  ;;  %v536_v6 = vld [vmem:[#allocation8 + $0x8] sm:$0xff]   ;;  %v541_v11 = vld [vmem:[#allocation8 + $0x30] sm:$0xff]   ;;  %s418_s13 = sshll.u32 %s748_s6, 4  ;;  %s419_s13 = int_to_ptr.vmem [resolvable:$true] %s418_s13 }
  0x82   :  { %474 = vmatpush3.bf16.msra.mxu0 %v533_v1  ;;  %482 = vmatpush3.bf16.msra.mxu1 %v535_v4  ;;  %v539_v9 = vld [vmem:[#allocation8 + $0x20] sm:$0xff]   ;;  %v540_v10 = vld [vmem:[#allocation8 + $0x28] sm:$0xff]   ;;  %v542_v12 = vld [vmem:[#allocation8 + $0x38] sm:$0xff]   ;;  %s705_s0 = scalar_lea.vmem %s419_s13, 128  ;;  %p710_p1 = scmp.lt.s32.totalorder %s419_s13, %s419_s13 }
  0x83   :  { %475 = vmatprep.subr.bf16.mxu0 %v746_v0  ;;  %483 = vmatprep.subr.bf16.mxu1 %v746_v0  ;;  %v543_v13 = vld [vmem:[#allocation11] sm:$0xff]   ;;  %v544_v14 = vld [vmem:[#allocation11 + $0x8] sm:$0xff]   ;;  %v545_v15 = vld [vmem:[#allocation11 + $0x10] sm:$0xff]   ;;  %p706_p0 = scmp.ne.s32.totalorder %s419_s13, %s705_s0  ;;  %p711_p2 = scmp.lt.s32.totalorder %s705_s0, %s705_s0 }
  0x84   :  { %v546_v16 = vld [vmem:[#allocation11 + $0x18] sm:$0xff]   ;;  %v547_v17 = vld [vmem:[#allocation11 + $0x20] sm:$0xff]   ;;  %v548_v18 = vld [vmem:[#allocation11 + $0x28] sm:$0xff]  }
  0x85   :  { %v430_v19 = vld [vmem:[#allocation7] ss:$0 sm:$0xff]  ;;  %v549_v27 = vld [vmem:[#allocation11 + $0x30] sm:$0xff]   ;;  %v434_v29 = vld [vmem:[#allocation10] ss:$0 sm:$0xff]  ;;  %p712_p3 = por %p711_p2, %p710_p1 }
  0x86   :  { %476 = vmatpush3.bf16.msra.mxu0 %v534_v2  ;;  %484 = vmatpush3.bf16.msra.mxu1 %v536_v6  ;;  %v550_v28 = vld [vmem:[#allocation11 + $0x38] sm:$0xff]   ;;  %v443_v37 = vld [vmem:[#allocation13] ss:$0 sm:$0xff] }
  0x87   :  { %501 = vmatprep.subr.bf16.mxu0 %v746_v0  ;;  %485 = vmatprep.subr.bf16.mxu1 %v746_v0  ;;  %p713_p4 = pnand %p712_p3, %p706_p0 }
  0x89   :  { %478 = vmatmul.mubr.msk.bf16.vlgmr.msra.gmra.mrb[0].mxu0 %vm140_vm1, %v116_v5 }
  0x8a   :  { %517 = vmatprep.mubr.msk.bf16.mxu0 %vm747_vm0, %v746_v0  ;;  %486 = vmatpush3.bf16.msra.mxu1 %v537_v7 }
  0x8b   :  { %487 = vmatprep.subr.bf16.mxu1 %v746_v0  ;;  %502 = vmatpush3.bf16.msra.mxu0 %v543_v13 }
  0x8c   :  { %503 = vmatprep.subr.bf16.mxu0 %v746_v0 }
  0x8e   :  { %488 = vmatpush3.bf16.msra.mxu1 %v538_v8 }
  0x8f   :  { %489 = vmatprep.subr.bf16.mxu1 %v746_v0  ;;  %504 = vmatpush3.bf16.msra.mxu0 %v544_v14 }
  0x90   :  { %505 = vmatprep.subr.bf16.mxu0 %v746_v0 }
  0x92   :  { %490 = vmatpush3.bf16.msra.mxu1 %v539_v9 }
  0x93   :  { %491 = vmatprep.subr.bf16.mxu1 %v746_v0  ;;  %506 = vmatpush3.bf16.msra.mxu0 %v545_v15 }
  0x94   :  { %507 = vmatprep.subr.bf16.mxu0 %v746_v0 }
  0x96   :  { %492 = vmatpush3.bf16.msra.mxu1 %v540_v10 }
  0x97   :  { %493 = vmatprep.subr.bf16.mxu1 %v746_v0  ;;  %508 = vmatpush3.bf16.msra.mxu0 %v546_v16 }
  0x98   :  { %509 = vmatprep.subr.bf16.mxu0 %v746_v0 }
  0x9a   :  { %494 = vmatpush3.bf16.msra.mxu1 %v541_v11 }
  0x9b   :  { %495 = vmatprep.subr.bf16.mxu1 %v746_v0  ;;  %510 = vmatpush3.bf16.msra.mxu0 %v547_v17 }
  0x9c   :  { %511 = vmatprep.subr.bf16.mxu0 %v746_v0 }
  0x9e   :  { %496 = vmatpush3.bf16.msra.mxu1 %v542_v12 }
  0x9f   :  { %512 = vmatpush3.bf16.msra.mxu0 %v548_v18 }
  0xa0   :  { %513 = vmatprep.subr.bf16.mxu0 %v746_v0 }
  0xa3   :  { %514 = vmatpush3.bf16.msra.mxu0 %v549_v27 }
  0xa4   :  { %515 = vmatprep.subr.bf16.mxu0 %v746_v0 }
  0xa7   :  { %516 = vmatpush3.bf16.msra.mxu0 %v550_v28 }
 0x15c   :  { %v178_v20 = vpop.f32.mrb[0].mxu0 }
 0x15d   :  { %v179_v21 = vadd.f32 %v430_v19, %v178_v20  ;;  %v479_v22 = vpop.f32.mrb[1].mxu0 }
 0x15e   :  { %v181_v23 = vpop.f32.mrb[2].mxu0 }
 0x15f   :  { %v184_v24 = vmax.f32 %v179_v21, 0.0  ;;  %v480_v25 = vpop.f32.mrb[3].mxu0 }
 0x161   :  { %v185_v26 = vpack.c.bf16 %v184_v24, %v184_v24 }
 0x163   :  { %498 = vmatmul.mubr.bf16.vlgmr.msra.gmra.mrb[0].mxu1 %v185_v26 }
 0x236   :  { %v291_v30 = vpop.f32.mrb[0].mxu1 }
 0x237   :  { %v292_v31 = vadd.f32 %v434_v29, %v291_v30  ;;  %v499_v32 = vpop.f32.mrb[1].mxu1 }
 0x238   :  { %v294_v33 = vpop.f32.mrb[2].mxu1 }
 0x239   :  { %v297_v34 = vmax.f32 %v292_v31, 0.0  ;;  %v500_v35 = vpop.f32.mrb[3].mxu1 }
 0x23b   :  { %v298_v36 = vpack.c.bf16 %v297_v34, %v297_v34 }
 0x23d   :  { %518 = vmatmul.mubr.bf16.vlgmr.msra.gmra.mrb[4].mxu0 %v298_v36 }
 0x310   :  { %v404_v38 = vpop.f32.mrb[4].mxu0 }
 0x311   :  { %v405_v39 = vadd.f32 %v443_v37, %v404_v38  ;;  %v519_v40 = vpop.f32.mrb[5].mxu0 }
 0x312   :  { %v407_v41 = vpop.f32.mrb[6].mxu0 }
 0x313   :  { %v410_v42 = vadd.f32 %v405_v39, %v888_v3  ;;  %v520_v43 = vpop.f32.mrb[7].mxu0 }
 0x315   :  { %411 = vst.msk [vmem:[#allocation14] sm:$0xff] %vm140_vm1, %v410_v42 }
 0x316   :  { %716 = shalt.err (!%p713_p4)
}
 0x317   :  { %s717_s15 = scalar_lea.hbm %s932_s7, 128 }
 0x318   :  { %p718_p5 = scmp.ne.s32.totalorder %s932_s7, %s717_s15  ;;  %p721_p6 = scmp.lt.u32.totalorder %s717_s15, %s932_s7 }
 0x31a   :  { %p723_p7 = pnand %p721_p6, %p718_p5 }
 0x31c   :  { %726 = shalt.err (!%p723_p7)
}
 0x31d   :  { %421 = dma.vmem_to_hbm [thread:$0]  %s419_s13, 128, %s932_s7, [#allocation4]  }
 0x31e   :  { %735 = dma.done.wait [#allocation4], 128  }
 0x31f   :  { %736 = vsyncadd [#allocation4], 4294967168 }
 0x320   :  { %425 = vsyncpa [#allocation3], 1 }
 0x321   :  { %426 = vsyncpa [#allocation6], 1 }
 0x322   :  { %427 = vsyncpa [#allocation9], 1 }
 0x323   :  { %428 = vsyncpa [#allocation12], 1 }
 0x324   :  { %429 = vsyncpa [#allocation4], 1 }

</bundles_post_ra>
